<compile_context>
chip_gen: v7x
topology: tpu7x:2x2x1
jax: 0.10.0
libtpu: 0.0.40
codegen_flags: <defaults>
</compile_context>

<pallas_src>
import functools
import math

import jax
import jax.numpy as jnp
from jax import lax
from jax.experimental import pallas as pl
from jax.experimental.pallas import tpu as pltpu


def _skipfeeddown_kernel(x_ref, m1_ref, b1_ref, m2_ref, b2_ref, o_ref, *, H):
    """Fused conv3x3 -> ReLU -> conv3x3 -> (+skip) on a (rows, W*Cp) block.

    x_ref  : (R, WC) f32     folded input rows (R = images_per_step * H)
    m*_ref : (3, WC, WC) bf16 banded conv matrices, one per vertical tap dy
    b*_ref : (1, WC) f32     bias tiled across W (padded channels are zero)
    o_ref  : (R, WC) f32
    """
    x = x_ref[...]                         # single HBM read; also used for skip
    R, WC = x.shape
    xb = x.astype(jnp.bfloat16)            # bf16 MXU operand, f32 accumulate

    # Vertical zero padding: rows of several images are stacked along the
    # sublane axis; (R,1) masks zero the wrapped/cross-image rows.
    row = lax.broadcasted_iota(jnp.int32, (R, 1), 0)
    top = (row % H) == 0
    bot = (row % H) == (H - 1)

    def shift_down(y):   # out[r] = y[r-1]; zero on each image's first row
        return jnp.where(top, 0.0, pltpu.roll(y, shift=1, axis=0))

    def shift_up(y):     # out[r] = y[r+1]; zero on each image's last row
        return jnp.where(bot, 0.0, pltpu.roll(y, shift=R - 1, axis=0))

    def conv3x3(inp_bf16, m_ref, b_ref):
        # One matmul per vertical tap; horizontal taps + horizontal zero
        # padding + channel mixing live inside the banded matrices.
        y0 = jnp.dot(inp_bf16, m_ref[0], preferred_element_type=jnp.float32)
        y1 = jnp.dot(inp_bf16, m_ref[1], preferred_element_type=jnp.float32)
        y2 = jnp.dot(inp_bf16, m_ref[2], preferred_element_type=jnp.float32)
        acc = y1 + b_ref[...]                      # (1,WC) bias broadcasts, f32
        acc = acc + shift_down(y0)
        acc = acc + shift_up(y2)
        return acc

    h1 = jnp.maximum(conv3x3(xb, m1_ref, b1_ref), 0.0)       # conv1 + ReLU
    y = conv3x3(h1.astype(jnp.bfloat16), m2_ref, b2_ref)      # conv2
    o_ref[...] = (y + x).astype(o_ref.dtype)   # downsample/last = Identity


def _band_matrices(w_oihw, W):
    """Fold horizontal taps + horizontal zero padding + channel mixing of a
    3x3 conv into 3 banded (W*Cin, W*Cout) matrices (one per vertical tap)."""
    w_hwio = jnp.transpose(w_oihw, (2, 3, 1, 0)).astype(jnp.float32)  # (3,3,Ci,Co)
    mats = []
    for dy in range(3):
        m = 0.0
        for dx in range(3):
            # shift[wi, w] = 1  iff  wi == w + dx - 1  (out-of-range => zero pad)
            shift = jnp.eye(W, W, k=1 - dx, dtype=jnp.float32)
            m = m + jnp.kron(shift, w_hwio[dy, dx])
        mats.append(m)
    return jnp.stack(mats)                                    # (3, W*Ci, W*Co)


def _choose_padded_channels(C, W, lane=128):
    """Smallest Cp >= C with (W*Cp) % lane == 0, unless padding is too wasteful."""
    g = math.gcd(W, lane)
    step = lane // g                      # Cp must be a multiple of this
    Cp = -(-C // step) * step
    return Cp if Cp <= max(8, 2 * C) else C


def _vmem_capacity_bytes():
    try:
        info = pltpu.get_tpu_info()
        cap = getattr(info, "vmem_capacity_bytes", None)
        if cap:
            return int(cap)
    except Exception:
        pass
    return 64 << 20                       # conservative fallback: v7x per-core VMEM


def skip_feed_down(x_nchw, w1_oihw, b1, w2_oihw, b2, *, images_per_step=None):
    """SkipFeedDown forward.  x_nchw: (N, C, H, W) float32; weights OIHW."""
    N, C, H, W = x_nchw.shape
    Cp = _choose_padded_channels(C, W)    # lane-dense: W*Cp multiple of 128 when cheap
    WC = W * Cp

    # ---- host-side glue: layout folding + weight preprocessing (done once) ----
    x_nhwc = jnp.transpose(x_nchw, (0, 2, 3, 1))
    if Cp != C:
        x_nhwc = jnp.pad(x_nhwc, ((0, 0), (0, 0), (0, 0), (0, Cp - C)))
    x2 = x_nhwc.reshape(N * H, WC).astype(jnp.float32)        # lane-dense rows, f32

    def pad_w(w):
        return jnp.pad(w, ((0, Cp - C), (0, Cp - C), (0, 0), (0, 0)))

    m1 = _band_matrices(pad_w(w1_oihw), W).astype(jnp.bfloat16)   # bf16 MXU operands
    m2 = _band_matrices(pad_w(w2_oihw), W).astype(jnp.bfloat16)
    b1p = jnp.pad(b1.astype(jnp.float32), (0, Cp - C))
    b2p = jnp.pad(b2.astype(jnp.float32), (0, Cp - C))
    b1f = jnp.tile(b1p, W).reshape(1, WC)
    b2f = jnp.tile(b2p, W).reshape(1, WC)

    # ---- VMEM accounting: weights + double-buffered x/out blocks + temps ----
    vmem_cap = _vmem_capacity_bytes()
    vmem_budget = (vmem_cap * 3) // 5                  # headroom for compiler scratch
    const_bytes = 2 * (2 * 3 * WC * WC * 2 + 2 * WC * 4)   # band mats + biases, 2x buffered
    per_image = H * WC * 4 * 16                        # x/out (2x buf) + f32 temporaries
    # TODO(synk): single-buffer the constant band matrices (pl.Buffered(1) or a
    # one-shot VMEM staging) once W*C grows enough for the 2x reservation to matter.
    # TODO(synk): switch to an H-strip im2col formulation once 2*3*(W*C)^2 weight
    # bytes approach ~half the scoped VMEM (~0.7-1k W*C on v7x, ~1-1.5k on v6e/v5e).

    if images_per_step is None:
        avail = max(vmem_budget - const_bytes, per_image)
        images_fit = max(1, min(N, avail // per_image))
        if N >= 2:                                     # keep >=2 grid steps for v7x's 2 TCs
            images_fit = min(images_fit, max(1, N // 2))
        images_per_step = None
        for cand in range(int(images_fit), 0, -1):
            if N % cand == 0 and (cand * H) % 8 == 0:  # keep the block (8,128)-legal
                images_per_step = cand
                break
        if images_per_step is None:
            images_per_step = N                        # full dim is always legal
    rows_per_step = images_per_step * H
    grid = (N // images_per_step,)

    kernel = functools.partial(_skipfeeddown_kernel, H=H)

    out2 = pl.pallas_call(
        kernel,
        out_shape=jax.ShapeDtypeStruct((N * H, WC), jnp.float32),
        grid_spec=pltpu.PrefetchScalarGridSpec(
            num_scalar_prefetch=0,
            grid=grid,
            in_specs=[
                pl.BlockSpec((rows_per_step, WC), lambda i: (i, 0)),
                pl.BlockSpec((3, WC, WC), lambda i: (0, 0, 0)),
                pl.BlockSpec((1, WC), lambda i: (0, 0)),
                pl.BlockSpec((3, WC, WC), lambda i: (0, 0, 0)),
                pl.BlockSpec((1, WC), lambda i: (0, 0)),
            ],
            out_specs=pl.BlockSpec((rows_per_step, WC), lambda i: (i, 0)),
        ),
        compiler_params=pltpu.CompilerParams(
            dimension_semantics=("parallel",),
            vmem_limit_bytes=int(vmem_cap * 3 // 4)),
    )(x2, m1, b1f, m2, b2f)

    # folded rows -> NHWC -> drop channel padding -> NCHW
    out_nhwc = out2.reshape(N, H, W, Cp)[..., :C]
    return jnp.transpose(out_nhwc, (0, 3, 1, 2)).astype(x_nchw.dtype)


def _reference(x_nchw, w1_oihw, b1, w2_oihw, b2):
    """Pure-JAX reference mirroring the PyTorch forward exactly (NCHW/OIHW)."""
    dn = ("NCHW", "OIHW", "NCHW")
    y = lax.conv_general_dilated(x_nchw, w1_oihw, (1, 1), ((1, 1), (1, 1)),
                                 dimension_numbers=dn)
    y = y + b1[None, :, None, None]
    y = jnp.maximum(y, 0.0)
    y = lax.conv_general_dilated(y, w2_oihw, (1, 1), ((1, 1), (1, 1)),
                                 dimension_numbers=dn)
    y = y + b2[None, :, None, None]
    return y + x_nchw          # downsample = Identity, last = Identity


if __name__ == "__main__":
    N, C, H, W = 2, 4, 16, 16

    key = jax.random.PRNGKey(0)
    kx, k1, kb1, k2, kb2 = jax.random.split(key, 5)

    x = jax.random.normal(kx, (N, C, H, W), jnp.float32)
    # Conv2d(C, C, 3, padding=1) parameter shapes: OIHW weights, (C,) bias.
    w1 = 0.1 * jax.random.normal(k1, (C, C, 3, 3), jnp.float32)
    b1 = 0.1 * jax.random.normal(kb1, (C,), jnp.float32)
    w2 = 0.1 * jax.random.normal(k2, (C, C, 3, 3), jnp.float32)
    b2 = 0.1 * jax.random.normal(kb2, (C,), jnp.float32)

    out = skip_feed_down(x, w1, b1, w2, b2)
    out = jax.block_until_ready(out)

    ref = _reference(x, w1, b1, w2, b2)
    assert out.shape == (N, C, H, W)
    # Tolerance loosened vs the pure-f32 version: the conv matmuls now run with
    # bf16 MXU operands (f32 accumulation), giving ~1e-2 worst-case abs error.
    assert jnp.allclose(out, ref, atol=3e-2, rtol=3e-2), "mismatch vs reference"

    print("KERNEL_OK")
</pallas_src>

<mosaic_0001>
module attributes {stable_mosaic.version = 11 : i64} {
  func.func @_skipfeeddown_kernel(%arg0: i32, %arg1: memref<16x128xf32, #tpu.memory_space<vmem>>, %arg2: memref<3x128x128xbf16, #tpu.memory_space<vmem>>, %arg3: memref<1x128xf32, #tpu.memory_space<vmem>>, %arg4: memref<3x128x128xbf16, #tpu.memory_space<vmem>>, %arg5: memref<1x128xf32, #tpu.memory_space<vmem>>, %arg6: memref<16x128xf32, #tpu.memory_space<vmem>>) attributes {dimension_semantics = [#tpu.dimension_semantics<parallel>], iteration_bounds = array<i64: 2>, scalar_prefetch = 0 : i64, scratch_operands = 0 : i64, tpu.core_type = #tpu.core_type<tc>, window_params = [{transform_indices = @transform_0, window_bounds = array<i64: 16, 128>}, {pipeline_mode = #tpu.pipeline_mode<synchronous>, transform_indices = @transform_1, window_bounds = array<i64: 3, 128, 128>}, {pipeline_mode = #tpu.pipeline_mode<synchronous>, transform_indices = @transform_2, window_bounds = array<i64: 1, 128>}, {pipeline_mode = #tpu.pipeline_mode<synchronous>, transform_indices = @transform_3, window_bounds = array<i64: 3, 128, 128>}, {pipeline_mode = #tpu.pipeline_mode<synchronous>, transform_indices = @transform_4, window_bounds = array<i64: 1, 128>}, {transform_indices = @transform_5, window_bounds = array<i64: 16, 128>}]} {
    %c0 = arith.constant 0 : index
    %c0_0 = arith.constant 0 : index
    %0 = vector.load %arg1[%c0, %c0_0] : memref<16x128xf32, #tpu.memory_space<vmem>>, vector<16x128xf32>
    %1 = arith.truncf %0 : vector<16x128xf32> to vector<16x128xbf16>
    %2 = tpu.iota {dimensions = array<i32: 0>} : vector<16x1xi32>
    %c16_i32 = arith.constant 16 : i32
    %c0_i32 = arith.constant 0 : i32
    %3 = arith.cmpi eq, %c16_i32, %c0_i32 : i32
    %c1_i32 = arith.constant 1 : i32
    %4 = arith.select %3, %c1_i32, %c16_i32 : i32
    %5 = vector.broadcast %4 : i32 to vector<16x1xi32>
    %6 = arith.remsi %2, %5 : vector<16x1xi32>
    %c0_i32_1 = arith.constant 0 : i32
    %7 = vector.broadcast %c0_i32_1 : i32 to vector<16x1xi32>
    %8 = arith.cmpi ne, %6, %7 : vector<16x1xi32>
    %c0_i32_2 = arith.constant 0 : i32
    %9 = vector.broadcast %c0_i32_2 : i32 to vector<16x1xi32>
    %10 = arith.cmpi slt, %6, %9 : vector<16x1xi32>
    %c0_i32_3 = arith.constant 0 : i32
    %11 = arith.cmpi slt, %4, %c0_i32_3 : i32
    %12 = vector.broadcast %11 : i1 to vector<16x1xi1>
    %13 = vector.broadcast %12 : vector<16x1xi1> to vector<16x1xi1>
    %14 = arith.xori %10, %13 : vector<16x1xi1>
    %15 = arith.andi %14, %8 : vector<16x1xi1>
    %16 = vector.broadcast %4 : i32 to vector<16x1xi32>
    %17 = arith.addi %6, %16 : vector<16x1xi32>
    %18 = arith.select %15, %17, %6 : vector<16x1xi1>, vector<16x1xi32>
    %c0_i32_4 = arith.constant 0 : i32
    %19 = vector.broadcast %c0_i32_4 : i32 to vector<16x1xi32>
    %20 = arith.cmpi eq, %18, %19 : vector<16x1xi32>
    %c16_i32_5 = arith.constant 16 : i32
    %c0_i32_6 = arith.constant 0 : i32
    %21 = arith.cmpi eq, %c16_i32_5, %c0_i32_6 : i32
    %c1_i32_7 = arith.constant 1 : i32
    %22 = arith.select %21, %c1_i32_7, %c16_i32_5 : i32
    %23 = vector.broadcast %22 : i32 to vector<16x1xi32>
    %24 = arith.remsi %2, %23 : vector<16x1xi32>
    %c0_i32_8 = arith.constant 0 : i32
    %25 = vector.broadcast %c0_i32_8 : i32 to vector<16x1xi32>
    %26 = arith.cmpi ne, %24, %25 : vector<16x1xi32>
    %c0_i32_9 = arith.constant 0 : i32
    %27 = vector.broadcast %c0_i32_9 : i32 to vector<16x1xi32>
    %28 = arith.cmpi slt, %24, %27 : vector<16x1xi32>
    %c0_i32_10 = arith.constant 0 : i32
    %29 = arith.cmpi slt, %22, %c0_i32_10 : i32
    %30 = vector.broadcast %29 : i1 to vector<16x1xi1>
    %31 = vector.broadcast %30 : vector<16x1xi1> to vector<16x1xi1>
    %32 = arith.xori %28, %31 : vector<16x1xi1>
    %33 = arith.andi %32, %26 : vector<16x1xi1>
    %34 = vector.broadcast %22 : i32 to vector<16x1xi32>
    %35 = arith.addi %24, %34 : vector<16x1xi32>
    %36 = arith.select %33, %35, %24 : vector<16x1xi1>, vector<16x1xi32>
    %c15_i32 = arith.constant 15 : i32
    %37 = vector.broadcast %c15_i32 : i32 to vector<16x1xi32>
    %38 = arith.cmpi eq, %36, %37 : vector<16x1xi32>
    %c0_11 = arith.constant 0 : index
    %c0_12 = arith.constant 0 : index
    %c0_13 = arith.constant 0 : index
    %39 = vector.load %arg2[%c0_11, %c0_12, %c0_13] : memref<3x128x128xbf16, #tpu.memory_space<vmem>>, vector<1x128x128xbf16>
    %40 = vector.shape_cast %39 : vector<1x128x128xbf16> to vector<128x128xbf16>
    %cst = arith.constant dense<0.000000e+00> : vector<16x128xf32>
    %41 = tpu.matmul %1, %40, %cst {dimension_numbers = #tpu.dot_dimension_numbers<[1], [0], [0], [1], [0, 0, 1, 1], [], []>} : vector<16x128xbf16>, vector<128x128xbf16>, vector<16x128xf32> -> vector<16x128xf32>
    %c1 = arith.constant 1 : index
    %c0_14 = arith.constant 0 : index
    %c0_15 = arith.constant 0 : index
    %42 = vector.load %arg2[%c1, %c0_14, %c0_15] : memref<3x128x128xbf16, #tpu.memory_space<vmem>>, vector<1x128x128xbf16>
    %43 = vector.shape_cast %42 : vector<1x128x128xbf16> to vector<128x128xbf16>
    %cst_16 = arith.constant dense<0.000000e+00> : vector<16x128xf32>
    %44 = tpu.matmul %1, %43, %cst_16 {dimension_numbers = #tpu.dot_dimension_numbers<[1], [0], [0], [1], [0, 0, 1, 1], [], []>} : vector<16x128xbf16>, vector<128x128xbf16>, vector<16x128xf32> -> vector<16x128xf32>
    %c2 = arith.constant 2 : index
    %c0_17 = arith.constant 0 : index
    %c0_18 = arith.constant 0 : index
    %45 = vector.load %arg2[%c2, %c0_17, %c0_18] : memref<3x128x128xbf16, #tpu.memory_space<vmem>>, vector<1x128x128xbf16>
    %46 = vector.shape_cast %45 : vector<1x128x128xbf16> to vector<128x128xbf16>
    %cst_19 = arith.constant dense<0.000000e+00> : vector<16x128xf32>
    %47 = tpu.matmul %1, %46, %cst_19 {dimension_numbers = #tpu.dot_dimension_numbers<[1], [0], [0], [1], [0, 0, 1, 1], [], []>} : vector<16x128xbf16>, vector<128x128xbf16>, vector<16x128xf32> -> vector<16x128xf32>
    %c0_20 = arith.constant 0 : index
    %c0_21 = arith.constant 0 : index
    %48 = vector.load %arg3[%c0_20, %c0_21] : memref<1x128xf32, #tpu.memory_space<vmem>>, vector<1x128xf32>
    %49 = vector.broadcast %48 : vector<1x128xf32> to vector<16x128xf32>
    %50 = arith.addf %44, %49 : vector<16x128xf32>
    %c1_i32_22 = arith.constant 1 : i32
    %51 = tpu.dynamic_rotate %41 by %c1_i32_22 dim 0 : vector<16x128xf32>, i32 -> vector<16x128xf32>
    %cst_23 = arith.constant 0.000000e+00 : f32
    %52 = vector.shape_cast %20 : vector<16x1xi1> to vector<16x1xi1>
    %53 = vector.broadcast %52 : vector<16x1xi1> to vector<16x128xi1>
    %54 = vector.broadcast %cst_23 : f32 to vector<16x128xf32>
    %55 = arith.select %53, %54, %51 : vector<16x128xi1>, vector<16x128xf32>
    %56 = arith.addf %50, %55 : vector<16x128xf32>
    %c15_i32_24 = arith.constant 15 : i32
    %57 = tpu.dynamic_rotate %47 by %c15_i32_24 dim 0 : vector<16x128xf32>, i32 -> vector<16x128xf32>
    %cst_25 = arith.constant 0.000000e+00 : f32
    %58 = vector.shape_cast %38 : vector<16x1xi1> to vector<16x1xi1>
    %59 = vector.broadcast %58 : vector<16x1xi1> to vector<16x128xi1>
    %60 = vector.broadcast %cst_25 : f32 to vector<16x128xf32>
    %61 = arith.select %59, %60, %57 : vector<16x128xi1>, vector<16x128xf32>
    %62 = arith.addf %56, %61 : vector<16x128xf32>
    %cst_26 = arith.constant 0.000000e+00 : f32
    %63 = vector.broadcast %cst_26 : f32 to vector<16x128xf32>
    %64 = arith.maximumf %62, %63 : vector<16x128xf32>
    %65 = arith.truncf %64 : vector<16x128xf32> to vector<16x128xbf16>
    %c0_27 = arith.constant 0 : index
    %c0_28 = arith.constant 0 : index
    %c0_29 = arith.constant 0 : index
    %66 = vector.load %arg4[%c0_27, %c0_28, %c0_29] : memref<3x128x128xbf16, #tpu.memory_space<vmem>>, vector<1x128x128xbf16>
    %67 = vector.shape_cast %66 : vector<1x128x128xbf16> to vector<128x128xbf16>
    %cst_30 = arith.constant dense<0.000000e+00> : vector<16x128xf32>
    %68 = tpu.matmul %65, %67, %cst_30 {dimension_numbers = #tpu.dot_dimension_numbers<[1], [0], [0], [1], [0, 0, 1, 1], [], []>} : vector<16x128xbf16>, vector<128x128xbf16>, vector<16x128xf32> -> vector<16x128xf32>
    %c1_31 = arith.constant 1 : index
    %c0_32 = arith.constant 0 : index
    %c0_33 = arith.constant 0 : index
    %69 = vector.load %arg4[%c1_31, %c0_32, %c0_33] : memref<3x128x128xbf16, #tpu.memory_space<vmem>>, vector<1x128x128xbf16>
    %70 = vector.shape_cast %69 : vector<1x128x128xbf16> to vector<128x128xbf16>
    %cst_34 = arith.constant dense<0.000000e+00> : vector<16x128xf32>
    %71 = tpu.matmul %65, %70, %cst_34 {dimension_numbers = #tpu.dot_dimension_numbers<[1], [0], [0], [1], [0, 0, 1, 1], [], []>} : vector<16x128xbf16>, vector<128x128xbf16>, vector<16x128xf32> -> vector<16x128xf32>
    %c2_35 = arith.constant 2 : index
    %c0_36 = arith.constant 0 : index
    %c0_37 = arith.constant 0 : index
    %72 = vector.load %arg4[%c2_35, %c0_36, %c0_37] : memref<3x128x128xbf16, #tpu.memory_space<vmem>>, vector<1x128x128xbf16>
    %73 = vector.shape_cast %72 : vector<1x128x128xbf16> to vector<128x128xbf16>
    %cst_38 = arith.constant dense<0.000000e+00> : vector<16x128xf32>
    %74 = tpu.matmul %65, %73, %cst_38 {dimension_numbers = #tpu.dot_dimension_numbers<[1], [0], [0], [1], [0, 0, 1, 1], [], []>} : vector<16x128xbf16>, vector<128x128xbf16>, vector<16x128xf32> -> vector<16x128xf32>
    %c0_39 = arith.constant 0 : index
    %c0_40 = arith.constant 0 : index
    %75 = vector.load %arg5[%c0_39, %c0_40] : memref<1x128xf32, #tpu.memory_space<vmem>>, vector<1x128xf32>
    %76 = vector.broadcast %75 : vector<1x128xf32> to vector<16x128xf32>
    %77 = arith.addf %71, %76 : vector<16x128xf32>
    %c1_i32_41 = arith.constant 1 : i32
    %78 = tpu.dynamic_rotate %68 by %c1_i32_41 dim 0 : vector<16x128xf32>, i32 -> vector<16x128xf32>
    %cst_42 = arith.constant 0.000000e+00 : f32
    %79 = vector.shape_cast %20 : vector<16x1xi1> to vector<16x1xi1>
    %80 = vector.broadcast %79 : vector<16x1xi1> to vector<16x128xi1>
    %81 = vector.broadcast %cst_42 : f32 to vector<16x128xf32>
    %82 = arith.select %80, %81, %78 : vector<16x128xi1>, vector<16x128xf32>
    %83 = arith.addf %77, %82 : vector<16x128xf32>
    %c15_i32_43 = arith.constant 15 : i32
    %84 = tpu.dynamic_rotate %74 by %c15_i32_43 dim 0 : vector<16x128xf32>, i32 -> vector<16x128xf32>
    %cst_44 = arith.constant 0.000000e+00 : f32
    %85 = vector.shape_cast %38 : vector<16x1xi1> to vector<16x1xi1>
    %86 = vector.broadcast %85 : vector<16x1xi1> to vector<16x128xi1>
    %87 = vector.broadcast %cst_44 : f32 to vector<16x128xf32>
    %88 = arith.select %86, %87, %84 : vector<16x128xi1>, vector<16x128xf32>
    %89 = arith.addf %83, %88 : vector<16x128xf32>
    %90 = arith.addf %89, %0 : vector<16x128xf32>
    %c0_45 = arith.constant 0 : index
    %c0_46 = arith.constant 0 : index
    %91 = vector.load %arg6[%c0_45, %c0_46] : memref<16x128xf32, #tpu.memory_space<vmem>>, vector<16x128xf32>
    tpu.vector_store %arg6[%c0_45, %c0_46], %90 {strides = array<i32>} : memref<16x128xf32, #tpu.memory_space<vmem>>, vector<16x128xf32>,
    return
  }
  func.func @transform_0(%arg0: i32) -> (i32, i32) {
    %c0_i32 = arith.constant 0 : i32
    %c0_i32_0 = arith.constant 0 : i32
    return %arg0, %c0_i32 : i32, i32
  }
  func.func @transform_1(%arg0: i32) -> (i32, i32, i32) {
    %c0_i32 = arith.constant 0 : i32
    %c0_i32_0 = arith.constant 0 : i32
    %c0_i32_1 = arith.constant 0 : i32
    %c0_i32_2 = arith.constant 0 : i32
    return %c0_i32, %c0_i32_0, %c0_i32_1 : i32, i32, i32
  }
  func.func @transform_2(%arg0: i32) -> (i32, i32) {
    %c0_i32 = arith.constant 0 : i32
    %c0_i32_0 = arith.constant 0 : i32
    %c0_i32_1 = arith.constant 0 : i32
    return %c0_i32, %c0_i32_0 : i32, i32
  }
  func.func @transform_3(%arg0: i32) -> (i32, i32, i32) {
    %c0_i32 = arith.constant 0 : i32
    %c0_i32_0 = arith.constant 0 : i32
    %c0_i32_1 = arith.constant 0 : i32
    %c0_i32_2 = arith.constant 0 : i32
    return %c0_i32, %c0_i32_0, %c0_i32_1 : i32, i32, i32
  }
  func.func @transform_4(%arg0: i32) -> (i32, i32) {
    %c0_i32 = arith.constant 0 : i32
    %c0_i32_0 = arith.constant 0 : i32
    %c0_i32_1 = arith.constant 0 : i32
    return %c0_i32, %c0_i32_0 : i32, i32
  }
  func.func @transform_5(%arg0: i32) -> (i32, i32) {
    %c0_i32 = arith.constant 0 : i32
    %c0_i32_0 = arith.constant 0 : i32
    return %arg0, %c0_i32 : i32, i32
  }
}

</mosaic_0001>

<bundles_post_ra>
// kernel: tpu_custom_call.1
= control target key start
LH: loop header
LB: loop body
LE: loop exit
PB: predicated region body
PF: predicated region fallthrough
CT: control target
= control target key end

     0   :  { %10 = vsyncpa [#allocation3], 0  ;;  %s2033_s0 = inlined_call_operand.hbm [shape: f32[32,128], index: 0, kind: input, shape index: {}]   ;;  %s2034_s1 = inlined_call_operand.hbm [shape: bf16[3,128,128], index: 1, kind: input, shape index: {}]   ;;  %s2035_s2 = inlined_call_operand.vmem [shape: f32[1,128], index: 2, kind: input, shape index: {}]   ;;  %s2036_s3 = inlined_call_operand.hbm [shape: bf16[3,128,128], index: 3, kind: input, shape index: {}]   ;;  %s2037_s4 = inlined_call_operand.vmem [shape: f32[1,128], index: 4, kind: input, shape index: {}]   ;;  %s2038_s5 = inlined_call_operand.hbm [shape: f32[32,128], index: 5, kind: output, shape index: {}]  }
   0x1   :  { %12 = vsyncpa [#allocation3 + $0x1], 0 }
   0x2   :  { %13 = vsyncpa [#allocation6], 0 }
   0x3   :  { %14 = vsyncpa [#allocation4], 0 }
   0x4   :  { %16 = vsyncpa [#allocation4 + $0x1], 0  ;;  %s1679_s18 = smov 0   ;;  %s1681_s19 = smov 0  }
   0x5   :  { %s1683_s20 = smov 0   ;;  %s1685_s21 = smov 0  }
   0x6 LB: > { %s1700_s22 = sadd.s32 4294967295, %s1635_s21   ;;  %s1112_s23 = sadd.s32 4294967294, %s1635_s21   ;;  %s1635_s21 = sphi %s1685_s21, %s2062_s21   ;;  %s1631_s20 = sphi %s1683_s20, %s2061_s20   ;;  %s1627_s19 = sphi %s1681_s19, %s2060_s19   ;;  %s1623_s18 = sphi %s1679_s18, %s2059_s18  }
   0x7   : > { %p42_p0 = scmp.ne.s32.totalorder %s1627_s19, %s1623_s18  ;;  %p2039_p1 = scmp.eq.s32.totalorder %s1700_s22, 0 }
   0x8   : > { %p156_p3 = scmp.eq.s32.totalorder %s1112_s23, 1  ;;  %p1113_p5 = scmp.ge.s32.totalorder %s1635_s21, 1 }
   0x9   : > { %p1709_p4 = por %p2039_p1, %p42_p0  ;;  %p163_p7 = scmp.lt.s32.totalorder %s1635_s21, 3 }
   0xa   : > { %p1714_p6 = por %p156_p3, %p42_p0  ;;  %s1637_s27 = smov [#allocation5]  }
   0xb   : > { %s2042_s24 = scalar_select %p1709_p4, 1, 0 }
   0xc   : > { %s2043_s25 = scalar_select %p1714_p6, 1, 0 }
   0xd   : > { %p1719_p8 = pnand %p1113_p5, %p163_p7  ;;  %s175_s28 = sshll.u32 %s1637_s27, 4  ;;  %s1723_s28 = int_to_ptr.vmem [resolvable:$true] %s175_s28 }
   0xe   : > { %s1638_s30 = smov [#allocation7]   ;;  %s1479_s9 = scalar_lea.hbm %s2034_s1, 3072 }
   0xf   : > { %p1368_p9 = pneg %p1719_p8  ;;  %s191_s6 = sshll.u32 %s1638_s30, 4  ;;  %s1734_s6 = int_to_ptr.vmem [resolvable:$true] %s191_s6 }
  0x10   : > { %p1480_p12 = scmp.ne.s32.totalorder %s2034_s1, %s1479_s9  ;;  %p1486_p5 = scmp.lt.u32.totalorder %s1479_s9, %s2034_s1 }
  0x11   : > { %p1730_p11 = pnand %p1368_p9, %p2039_p1 }
  0x13   : > { %p1481_p13 = pneg %p1730_p11 }
  0x15   : > { %p1482_p0 = pnand %p1481_p13, %p1480_p12 }
  0x17   : > { %p1483_p3 = pneg %p1482_p0 }
  0x19   : > { %p1488_p7 = pnand %p1486_p5, %p1483_p3 }
  0x1b   : > { %1491 = shalt.err (!%p1488_p7)
}
  0x1c   : > { %s1492_s14 = scalar_lea.vmem %s1723_s28, 3072  ;;  %p1500_p2 = scmp.lt.s32.totalorder %s1723_s28, %s1723_s28 }
  0x1d   : > { %p1493_p9 = scmp.ne.s32.totalorder %s1723_s28, %s1492_s14  ;;  %p1501_p12 = scmp.lt.s32.totalorder %s1492_s14, %s1492_s14 }
  0x1f   : > { %p1495_p10 = pnand %p1493_p9, %p1481_p13  ;;  %p1502_p0 = por %p1501_p12, %p1500_p2 }
  0x21   : > { %p1496_p1 = pneg %p1495_p10 }
  0x23   : > { %p1503_p6 = pnand %p1502_p0, %p1496_p1 }
  0x25   : > { %1506 = shalt.err (!%p1503_p6)
}
  0x26   : > { %s1639_s15 = smov 64   ;;  %s1640_s16 = smov 4  }
  0x27   : > { %1371 = dma.hbm_to_vmem [thread:$0]  (!%p1730_p11), %s2034_s1, 3072, %s1723_s28, [#allocation6], %s1639_s15, %s1639_s15, %s1640_s16  }
  0x28   : > { %s1507_s7 = scalar_lea.hbm %s2036_s3, 3072 }
  0x29   : > { %p1508_p2 = scmp.ne.s32.totalorder %s2036_s3, %s1507_s7  ;;  %p1514_p10 = scmp.lt.u32.totalorder %s1507_s7, %s2036_s3 }
  0x2b   : > { %p1510_p1 = pnand %p1508_p2, %p1481_p13 }
  0x2d   : > { %p1511_p6 = pneg %p1510_p1 }
  0x2f   : > { %p1516_p3 = pnand %p1514_p10, %p1511_p6 }
  0x31   : > { %1519 = shalt.err (!%p1516_p3)
}
  0x32   : > { %s1520_s28 = scalar_lea.vmem %s1734_s6, 3072  ;;  %p1528_p12 = scmp.lt.s32.totalorder %s1734_s6, %s1734_s6 }
  0x33   : > { %p1521_p5 = scmp.ne.s32.totalorder %s1734_s6, %s1520_s28  ;;  %p1529_p0 = scmp.lt.s32.totalorder %s1520_s28, %s1520_s28 }
  0x35   : > { %p1523_p7 = pnand %p1521_p5, %p1481_p13  ;;  %p1530_p2 = por %p1529_p0, %p1528_p12 }
  0x37   : > { %p1524_p9 = pneg %p1523_p7 }
  0x39   : > { %p1531_p1 = pnand %p1530_p2, %p1524_p9 }
  0x3b   : > { %1534 = shalt.err (!%p1531_p1)
}
  0x3c   : > { %1374 = dma.hbm_to_vmem [thread:$0]  (!%p1730_p11), %s2036_s3, 3072, %s1734_s6, [#allocation6], %s1639_s15, %s1639_s15, %s1640_s16  }
  0x3d   : > { %s1789_s14 = sadd.s32 1, %s1635_s21   ;;  %s29_s29 = sadd.s32 1, %s1631_s20 }
  0x3e   : > { %s26_s17 = ssub.s32 %s1635_s21, %s1789_s14  ;;  %p36_p13 = scmp.ne.s32.totalorder %s1631_s20, %s1627_s19 }
  0x3f   : > { %p27_p6 = scmp.eq.s32.totalorder %s26_s17, 0  ;;  %p37_p10 = scmp.eq.s32.totalorder %s1635_s21, 0 }
  0x40   : > { %p2046_p3 = scmp.eq.s32.totalorder %s1700_s22, 1  ;;  %p1385_p7 = scmp.lt.s32.totalorder %s1635_s21, 2 }
  0x41   : > { %s1805_s27 = scalar_select %p27_p6, %s1631_s20, %s29_s29  }
  0x42   : > { %p1799_p5 = por %p2046_p3, %p36_p13  ;;  %p38_p9 = por %p37_p10, %p36_p13 }
  0x43   : > { %s208_s30 = sand.u32 1, %s1631_s20   ;;  %s1180_s6 = sshll.u32 %s1635_s21, 8 }
  0x44   : > { %s2047_s23 = scalar_select %p1799_p5, 1, 0 }
  0x45   : > { %s1117_s7 = sshll.u32 %s208_s30, 4  ;;  %s1812_s8 = scalar_lea.hbm %s2033_s0, %s1180_s6 }
  0x46   : > { %s212_s9 = scalar_lea.vmem [#allocation2], %s1117_s7  ;;  %p1816_p11 = pnand %p1385_p7, %p38_p9 }
  0x47   : > { %s219_s10 = sshll.u32 %s212_s9, 4  ;;  %s1820_s28 = scalar_lea.sflag [#allocation3], %s208_s30  ;;  %s1814_s10 = int_to_ptr.vmem [resolvable:$true] %s219_s10 }
  0x48   : > { %s1535_s12 = scalar_lea.hbm %s1812_s8, 256  ;;  %p1537_p0 = pneg %p1816_p11 }
  0x49   : > { %p1536_p12 = scmp.ne.s32.totalorder %s1812_s8, %s1535_s12  ;;  %s1540_s17 = scalar_lea.hbm %s2033_s0, 512 }
  0x4a   : > { %p1541_p13 = scmp.lt.u32.totalorder %s1812_s8, %s2033_s0  ;;  %p1542_p6 = scmp.lt.u32.totalorder %s1540_s17, %s1535_s12 }
  0x4b   : > { %p1538_p2 = pnand %p1537_p0, %p1536_p12  ;;  %p1544_p3 = scmp.lt.u32.totalorder %s1535_s12, %s1812_s8 }
  0x4c   : > { %p1543_p10 = por %p1542_p6, %p1541_p13 }
  0x4d   : > { %p1539_p1 = pneg %p1538_p2 }
  0x4e   : > { %p1545_p7 = por %p1544_p3, %p1543_p10 }
  0x50   : > { %p1546_p9 = pnand %p1545_p7, %p1539_p1 }
  0x52   : > { %1549 = shalt.err (!%p1546_p9)
}
  0x53   : > { %s1550_s30 = scalar_lea.vmem %s1814_s10, 256  ;;  %s1641_s15 = smov [#allocation2]  }
  0x54   : > { %p1551_p12 = scmp.ne.s32.totalorder %s1814_s10, %s1550_s30  ;;  %s1555_s16 = sshll.u32 %s1641_s15, 4  ;;  %s1556_s16 = int_to_ptr.vmem [resolvable:$false] %s1555_s16 }
  0x55   : > { %s1557_s9 = scalar_lea.vmem %s1556_s16, 512  ;;  %p1558_p4 = scmp.lt.s32.totalorder %s1814_s10, %s1556_s16 }
  0x56   : > { %p1553_p2 = pnand %p1551_p12, %p1537_p0  ;;  %p1559_p13 = scmp.lt.s32.totalorder %s1557_s9, %s1550_s30 }
  0x58   : > { %p1554_p5 = pneg %p1553_p2  ;;  %p1560_p6 = por %p1559_p13, %p1558_p4 }
  0x5a   : > { %p1561_p10 = pnand %p1560_p6, %p1554_p5 }
  0x5c   : > { %1564 = shalt.err (!%p1561_p10)
}
  0x5d   : > { %s1642_s12 = smov 128   ;;  %s1643_s13 = smov 8  }
  0x5e   : > { %1378 = dma.hbm_to_vmem [thread:$0]  (!%p1816_p11), %s1812_s8, 256, %s1814_s10, %s1820_s28, %s1642_s12, %s1642_s12, %s1643_s13  }
  0x5f   : > { %231 = sbr.rel (%p1719_p8) target bundleno = 665 (0x299), region = 40  ;;  %s1851_s29 = sand.u32 (!%p1719_p8), 1, %s1627_s19  }
  0x60   : > { %s1121_s17 = sshll.u32 (!%p1719_p8), %s1851_s29, 4  ;;  %s234_s7 = scalar_lea.sflag (!%p1719_p8), [#allocation3], %s1851_s29 }
  0x61   : > { %s1857_s6 = scalar_lea.vmem (!%p1719_p8), [#allocation2], %s1121_s17  ;;  %p2049_p4 = scmp.ne.s32.totalorder (!%p1719_p8), %s2042_s24, 0 }
  0x66   : > { %1610 = dma.done.wait (%p2049_p4), %s234_s7, 256  }
  0x67   : > { %1612 = vsyncadd (%p2049_p4), %s234_s7, 4294967040  ;;  %p2050_p5 = scmp.eq.s32.totalorder %s1700_s22, 0 }
  0x69   : > { %1614 = dma.done.wait (%p2050_p5), [#allocation6], 6144   ;;  %p2051_p8 = pmov %p2050_p5 }
  0x6a   : > { %v1644_v0 = vmov 0.0   ;;  %vm1645_vm0 = vmmov 0   ;;  %v1431_v1 = vld [vmem:[#allocation5] sm:$0xff]   ;;  %v1432_v2 = vld [vmem:[#allocation5 + $0x8] sm:$0xff]   ;;  %v1433_v3 = vld [vmem:[#allocation5 + $0x10] sm:$0xff]   ;;  %v278_v44 = vlaneseq  ;;  %s271_s11 = scalar_lea.vmem [#allocation8], %s1121_s17 }
  0x6b   : > { %1616 = vsyncadd (%p2051_p8), [#allocation6], 4294961152  ;;  %1236 = vmatprep.subr.bf16.mxu0 %v1644_v0  ;;  %1256 = vmatprep.subr.bf16.mxu1 %v1644_v0  ;;  %v1439_v4 = vld [vmem:[#allocation5 + $0x80] sm:$0xff]   ;;  %v1434_v5 = vld [vmem:[#allocation5 + $0x18] sm:$0xff]   ;;  %s1020_s28 = sshll.u32 %s271_s11, 4  ;;  %s1181_s30 = sshll.u32 %s1700_s22, 8  ;;  %s1988_s28 = int_to_ptr.vmem [resolvable:$true] %s1020_s28 }
  0x6c   : > { %1252 = vmatprep.mubr.msk.bf16.mxu0 %vm1645_vm0, %v1644_v0  ;;  %1272 = vmatprep.mubr.msk.bf16.mxu1 %vm1645_vm0, %v1644_v0  ;;  %v1441_v6 = vld [vmem:[#allocation5 + $0x88] sm:$0xff]   ;;  %v1435_v7 = vld [vmem:[#allocation5 + $0x20] sm:$0xff]   ;;  %v1443_v8 = vld [vmem:[#allocation5 + $0x90] sm:$0xff]   ;;  %v1926_v45 = vshrl.u32 %v278_v44, 7  ;;  %s1986_s9 = scalar_lea.hbm %s2038_s5, %s1181_s30  ;;  %s1007_s22 = scalar_lea.sflag [#allocation4], %s1851_s29 }
  0x6d   : > { %1237 = vmatpush3.bf16.msra.mxu0 %v1431_v1  ;;  %1257 = vmatpush3.bf16.msra.mxu1 %v1439_v4  ;;  %v1436_v9 = vld [vmem:[#allocation5 + $0x28] sm:$0xff]   ;;  %v1445_v10 = vld [vmem:[#allocation5 + $0x98] sm:$0xff]   ;;  %v1437_v11 = vld [vmem:[#allocation5 + $0x30] sm:$0xff]   ;;  %s1565_s12 = scalar_lea.vmem %s1988_s28, 256  ;;  %p2056_p0 = scmp.ne.s32.totalorder %s2047_s23, 0 }
  0x6e   : > { %1238 = vmatprep.subr.bf16.mxu0 %v1644_v0  ;;  %1258 = vmatprep.subr.bf16.mxu1 %v1644_v0  ;;  %v1447_v12 = vld [vmem:[#allocation5 + $0xa0] sm:$0xff]   ;;  %v1438_v13 = vld [vmem:[#allocation5 + $0x38] sm:$0xff]   ;;  %v1449_v16 = vld [vmem:[#allocation5 + $0xa8] sm:$0xff]   ;;  %vm635_vm1 = vcmp.lt.s32.totalorder %v1926_v45, 1  ;;  %vm648_vm2 = vcmp.lt.s32.totalorder %v1926_v45, 7  ;;  %v285_v62 = vand.u32 15, %v1926_v45  ;;  %p1566_p11 = scmp.ne.s32.totalorder %s1988_s28, %s1565_s12 }
  0x6f   : > { %v1884_v14 = vld [vmem:[%s1857_s6] sm:$0xff]  ;;  %v1887_v15 = vld [vmem:[%s1857_s6 + $0x8] sm:$0xff]  ;;  %v280_v63 = vadd.s32 8, %v1926_v45  ;;  %s1646_s13 = smov [#allocation8]  }
  0x70   : > { %v1440_v17 = vld [vmem:[#allocation5 + $0x40] sm:$0xff]   ;;  %v1451_v18 = vld [vmem:[#allocation5 + $0xb0] sm:$0xff]   ;;  %v277_v19 = vpack.c.bf16 %v1887_v15, %v1884_v14  ;;  %v1442_v20 = vld [vmem:[#allocation5 + $0x48] sm:$0xff]   ;;  %vm1943_vm3 = vcmp.eq.s32.totalorder %v285_v62, 0  ;;  %p1567_p1 = pnand %p1566_p11, %p2056_p0  ;;  %s1569_s17 = sshll.u32 %s1646_s13, 4  ;;  %s1570_s17 = int_to_ptr.vmem [resolvable:$false] %s1569_s17 }
  0x71   : > { %1239 = vmatpush3.bf16.msra.mxu0 %v1432_v2  ;;  %1259 = vmatpush3.bf16.msra.mxu1 %v1441_v6  ;;  %v1453_v21 = vld [vmem:[#allocation5 + $0xb8] sm:$0xff]   ;;  %v1444_v22 = vld [vmem:[#allocation5 + $0x50] sm:$0xff]   ;;  %v1448_v24 = vld [vmem:[#allocation5 + $0x60] sm:$0xff]   ;;  %s1571_s7 = scalar_lea.vmem %s1570_s17, 512  ;;  %p1572_p7 = scmp.lt.s32.totalorder %s1988_s28, %s1570_s17 }
  0x72   : > { %1240 = vmatprep.subr.bf16.mxu0 %v1644_v0  ;;  %1260 = vmatprep.subr.bf16.mxu1 %v1644_v0  ;;  %v1446_v23 = vld [vmem:[#allocation5 + $0x58] sm:$0xff]   ;;  %v1450_v25 = vld [vmem:[#allocation5 + $0x68] sm:$0xff]   ;;  %v1452_v26 = vld [vmem:[#allocation5 + $0x70] sm:$0xff]   ;;  %p1568_p3 = pneg %p1567_p1  ;;  %p1573_p9 = scmp.lt.s32.totalorder %s1571_s7, %s1565_s12 }
  0x73   : > { %v1454_v27 = vld [vmem:[#allocation5 + $0x78] sm:$0xff]   ;;  %v1455_v28 = vld [vmem:[#allocation7] sm:$0xff]   ;;  %v1457_v30 = vld [vmem:[#allocation7 + $0x8] sm:$0xff]  }
  0x74   : > { %v1456_v29 = vld [vmem:[#allocation7 + $0x80] sm:$0xff]   ;;  %v1458_v31 = vld [vmem:[#allocation7 + $0x88] sm:$0xff]   ;;  %v1459_v32 = vld [vmem:[#allocation7 + $0x10] sm:$0xff]   ;;  %p1574_p12 = por %p1573_p9, %p1572_p7 }
  0x75   : > { %1241 = vmatpush3.bf16.msra.mxu0 %v1433_v3  ;;  %1261 = vmatpush3.bf16.msra.mxu1 %v1443_v8  ;;  %v1460_v33 = vld [vmem:[#allocation7 + $0x90] sm:$0xff]   ;;  %v1461_v34 = vld [vmem:[#allocation7 + $0x18] sm:$0xff]   ;;  %v1463_v36 = vld [vmem:[#allocation7 + $0x20] sm:$0xff]   ;;  %v292_v3 = vand.u32 15, %v280_v63 }
  0x76   : > { %1242 = vmatprep.subr.bf16.mxu0 %v1644_v0  ;;  %1262 = vmatprep.subr.bf16.mxu1 %v1644_v0  ;;  %v1462_v35 = vld [vmem:[#allocation7 + $0x98] sm:$0xff]   ;;  %v1464_v37 = vld [vmem:[#allocation7 + $0xa0] sm:$0xff]   ;;  %v1465_v38 = vld [vmem:[#allocation7 + $0x28] sm:$0xff]   ;;  %p1575_p2 = pnand %p1574_p12, %p1568_p3 }
  0x77   : > { %v1466_v39 = vld [vmem:[#allocation7 + $0xa8] sm:$0xff]   ;;  %v1467_v40 = vld [vmem:[#allocation7 + $0x30] sm:$0xff]   ;;  %v1469_v42 = vld [vmem:[#allocation7 + $0x38] sm:$0xff]   ;;  %vm1949_vm4 = vcmp.eq.s32.totalorder %v292_v3, 15 }
  0x78   : > { %v1468_v41 = vld [vmem:[#allocation7 + $0xb0] sm:$0xff]   ;;  %v1470_v43 = vld [vmem:[#allocation7 + $0xb8] sm:$0xff]   ;;  %v1141_v1 = vld [vmem:[%s2035_s2] ss:$0 sm:$0xff] }
  0x79   : > { %1243 = vmatpush3.bf16.msra.mxu0 %v1434_v5  ;;  %1263 = vmatpush3.bf16.msra.mxu1 %v1445_v10 }
  0x7a   : > { %1244 = vmatprep.subr.bf16.mxu0 %v1644_v0  ;;  %1264 = vmatprep.subr.bf16.mxu1 %v1644_v0 }
  0x7d   : > { %1245 = vmatpush3.bf16.msra.mxu0 %v1435_v7  ;;  %1265 = vmatpush3.bf16.msra.mxu1 %v1447_v12 }
  0x7e   : > { %1246 = vmatprep.subr.bf16.mxu0 %v1644_v0  ;;  %1266 = vmatprep.subr.bf16.mxu1 %v1644_v0 }
  0x81   : > { %1247 = vmatpush3.bf16.msra.mxu0 %v1436_v9  ;;  %1267 = vmatpush3.bf16.msra.mxu1 %v1449_v16 }
  0x82   : > { %1248 = vmatprep.subr.bf16.mxu0 %v1644_v0  ;;  %1268 = vmatprep.subr.bf16.mxu1 %v1644_v0 }
  0x85   : > { %1249 = vmatpush3.bf16.msra.mxu0 %v1437_v11  ;;  %1269 = vmatpush3.bf16.msra.mxu1 %v1451_v18 }
  0x86   : > { %1250 = vmatprep.subr.bf16.mxu0 %v1644_v0  ;;  %1270 = vmatprep.subr.bf16.mxu1 %v1644_v0 }
  0x89   : > { %1251 = vmatpush3.bf16.msra.mxu0 %v1438_v13  ;;  %1271 = vmatpush3.bf16.msra.mxu1 %v1453_v21  ;;  %v1471_v21 = vld [vmem:[#allocation7 + $0x40] sm:$0xff]  }
  0x8a   : > { %1276 = vmatprep.subr.bf16.mxu0 %v1644_v0  ;;  %1296 = vmatprep.subr.bf16.mxu1 %v1644_v0 }
  0x8c   : > { %1253 = vmatmul.mubr.bf16.vlgmr.msra.gmra.mrb[0].mxu0 %v277_v19  ;;  %1273 = vmatmul.mubr.bf16.vlgmr.msra.gmra.mrb[0].mxu1 %v277_v19 }
  0x8d   : > { %1277 = vmatpush3.bf16.msra.mxu0 %v1440_v17  ;;  %1292 = vmatprep.mubr.msk.bf16.mxu0 %vm1645_vm0, %v1644_v0 }
  0x8e   : > { %1278 = vmatprep.subr.bf16.mxu0 %v1644_v0  ;;  %1312 = vmatprep.mubr.msk.bf16.mxu1 %vm1645_vm0, %v1644_v0 }
  0x8f   : > { %1297 = vmatpush3.bf16.msra.mxu1 %v1455_v28  ;;  %v1477_v28 = vld [vmem:[#allocation7 + $0x70] sm:$0xff]  }
  0x90   : > { %1298 = vmatprep.subr.bf16.mxu1 %v1644_v0 }
  0x91   : > { %1279 = vmatpush3.bf16.msra.mxu0 %v1442_v20 }
  0x92   : > { %1280 = vmatprep.subr.bf16.mxu0 %v1644_v0 }
  0x93   : > { %1299 = vmatpush3.bf16.msra.mxu1 %v1457_v30 }
  0x94   : > { %1300 = vmatprep.subr.bf16.mxu1 %v1644_v0 }
  0x95   : > { %1281 = vmatpush3.bf16.msra.mxu0 %v1444_v22 }
  0x96   : > { %1282 = vmatprep.subr.bf16.mxu0 %v1644_v0 }
  0x97   : > { %1301 = vmatpush3.bf16.msra.mxu1 %v1459_v32 }
  0x98   : > { %1302 = vmatprep.subr.bf16.mxu1 %v1644_v0 }
  0x99   : > { %1283 = vmatpush3.bf16.msra.mxu0 %v1446_v23  ;;  %v1472_v23 = vld [vmem:[#allocation7 + $0x48] sm:$0xff]  }
  0x9a   : > { %1284 = vmatprep.subr.bf16.mxu0 %v1644_v0 }
  0x9b   : > { %1303 = vmatpush3.bf16.msra.mxu1 %v1461_v34 }
  0x9c   : > { %1304 = vmatprep.subr.bf16.mxu1 %v1644_v0 }
  0x9d   : > { %1285 = vmatpush3.bf16.msra.mxu0 %v1448_v24  ;;  %v1473_v24 = vld [vmem:[#allocation7 + $0x50] sm:$0xff]  }
  0x9e   : > { %1286 = vmatprep.subr.bf16.mxu0 %v1644_v0 }
  0x9f   : > { %1305 = vmatpush3.bf16.msra.mxu1 %v1463_v36 }
  0xa0   : > { %1306 = vmatprep.subr.bf16.mxu1 %v1644_v0 }
  0xa1   : > { %1287 = vmatpush3.bf16.msra.mxu0 %v1450_v25  ;;  %v1474_v25 = vld [vmem:[#allocation7 + $0x58] sm:$0xff]  }
  0xa2   : > { %1288 = vmatprep.subr.bf16.mxu0 %v1644_v0 }
  0xa3   : > { %1307 = vmatpush3.bf16.msra.mxu1 %v1465_v38 }
  0xa4   : > { %1308 = vmatprep.subr.bf16.mxu1 %v1644_v0 }
  0xa5   : > { %1289 = vmatpush3.bf16.msra.mxu0 %v1452_v26  ;;  %v1475_v26 = vld [vmem:[#allocation7 + $0x60] sm:$0xff]  }
  0xa6   : > { %1290 = vmatprep.subr.bf16.mxu0 %v1644_v0 }
  0xa7   : > { %1309 = vmatpush3.bf16.msra.mxu1 %v1467_v40 }
  0xa8   : > { %1310 = vmatprep.subr.bf16.mxu1 %v1644_v0 }
  0xa9   : > { %1291 = vmatpush3.bf16.msra.mxu0 %v1454_v27  ;;  %v1476_v27 = vld [vmem:[#allocation7 + $0x68] sm:$0xff]  }
  0xaa   : > { %1316 = vmatprep.subr.bf16.mxu0 %v1644_v0 }
  0xab   : > { %1311 = vmatpush3.bf16.msra.mxu1 %v1469_v42 }
  0xac   : > { %1293 = vmatmul.mubr.bf16.vlgmr.msra.gmra.mrb[4].mxu0 %v277_v19  ;;  %1336 = vmatprep.subr.bf16.mxu1 %v1644_v0 }
  0xad   : > { %1332 = vmatprep.mubr.msk.bf16.mxu0 %vm1645_vm0, %v1644_v0  ;;  %1317 = vmatpush3.bf16.msra.mxu0 %v1456_v29  ;;  %v1478_v29 = vld [vmem:[#allocation7 + $0x78] sm:$0xff]  }
  0xae   : > { %1318 = vmatprep.subr.bf16.mxu0 %v1644_v0 }
  0xb1   : > { %1319 = vmatpush3.bf16.msra.mxu0 %v1458_v31 }
  0xb2   : > { %1320 = vmatprep.subr.bf16.mxu0 %v1644_v0 }
  0xb5   : > { %1321 = vmatpush3.bf16.msra.mxu0 %v1460_v33 }
  0xb6   : > { %1322 = vmatprep.subr.bf16.mxu0 %v1644_v0 }
  0xb9   : > { %1323 = vmatpush3.bf16.msra.mxu0 %v1462_v35 }
  0xba   : > { %1324 = vmatprep.subr.bf16.mxu0 %v1644_v0 }
  0xbd   : > { %1325 = vmatpush3.bf16.msra.mxu0 %v1464_v37 }
  0xbe   : > { %1326 = vmatprep.subr.bf16.mxu0 %v1644_v0 }
  0xc1   : > { %1327 = vmatpush3.bf16.msra.mxu0 %v1466_v39 }
  0xc2   : > { %1328 = vmatprep.subr.bf16.mxu0 %v1644_v0 }
  0xc5   : > { %1329 = vmatpush3.bf16.msra.mxu0 %v1468_v41 }
  0xc6   : > { %1330 = vmatprep.subr.bf16.mxu0 %v1644_v0 }
  0xc9   : > { %1331 = vmatpush3.bf16.msra.mxu0 %v1470_v43 }
 0x15f   : > { %v407_v46 = vpop.f32.mrb[0].mxu0  ;;  %v530_v54 = vpop.f32.mrb[0].mxu1 }
 0x160   : > { %v633_v47 = vrot.slane %v407_v46, 7  ;;  %v1254_v48 = vpop.f32.mrb[1].mxu0  ;;  %v646_v55 = vrot.slane %v530_v54, 1  ;;  %v1274_v56 = vpop.f32.mrb[1].mxu1  ;;  %v1166_v46 = vld [vmem:[%s2037_s4] ss:$0 sm:$0xff] }
 0x161   : > { %v410_v49 = vpop.f32.mrb[2].mxu0  ;;  %v533_v57 = vpop.f32.mrb[2].mxu1 }
 0x162   : > { %v634_v50 = vrot.slane %v410_v49, 7  ;;  %v1255_v51 = vpop.f32.mrb[3].mxu0  ;;  %v647_v58 = vrot.slane %v533_v57, 1  ;;  %v1275_v59 = vpop.f32.mrb[3].mxu1 }
 0x164   : > { %v637_v52 = vsel %vm635_vm1, %v634_v50, %v633_v47  ;;  %v636_v53 = vsel %vm635_vm1, %v633_v47, %v634_v50  ;;  %v649_v60 = vsel %vm648_vm2, %v646_v55, %v647_v58  ;;  %v650_v61 = vsel %vm648_vm2, %v647_v58, %v646_v55 }
 0x165   : > { %v642_v7 = vsel %vm1943_vm3, 0.0, %v637_v52  ;;  %v656_v17 = vsel %vm1949_vm4, 0.0, %v650_v61 }
 0x17f   : > { %v626_v4 = vpop.f32.mrb[4].mxu0 }
 0x180   : > { %v627_v5 = vadd.f32 %v1141_v1, %v626_v4  ;;  %v1294_v6 = vpop.f32.mrb[5].mxu0 }
 0x181   : > { %v629_v8 = vpop.f32.mrb[6].mxu0 }
 0x182   : > { %v644_v9 = vadd.f32 %v642_v7, %v627_v5  ;;  %v630_v11 = vadd.f32 %v1141_v1, %v629_v8  ;;  %v1295_v12 = vpop.f32.mrb[7].mxu0 }
 0x184   : > { %v657_v13 = vadd.f32 %v649_v60, %v644_v9  ;;  %v645_v16 = vadd.f32 %v636_v53, %v630_v11 }
 0x186   : > { %v658_v18 = vadd.f32 %v656_v17, %v645_v16  ;;  %v659_v19 = vmax.f32 %v657_v13, 0.0 }
 0x188   : > { %v660_v20 = vmax.f32 %v658_v18, 0.0 }
 0x18a   : > { %v661_v22 = vpack.c.bf16 %v660_v20, %v659_v19 }
 0x18c   : > { %1313 = vmatmul.mubr.bf16.vlgmr.msra.gmra.mrb[4].mxu1 %v661_v22  ;;  %1333 = vmatmul.mubr.bf16.vlgmr.msra.gmra.mrb[8].mxu0 %v661_v22 }
 0x18d   : > { %1337 = vmatpush3.bf16.msra.mxu1 %v1471_v21  ;;  %1352 = vmatprep.mubr.msk.bf16.mxu1 %vm1645_vm0, %v1644_v0 }
 0x18e   : > { %1338 = vmatprep.subr.bf16.mxu1 %v1644_v0 }
 0x191   : > { %1339 = vmatpush3.bf16.msra.mxu1 %v1472_v23 }
 0x192   : > { %1340 = vmatprep.subr.bf16.mxu1 %v1644_v0 }
 0x195   : > { %1341 = vmatpush3.bf16.msra.mxu1 %v1473_v24 }
 0x196   : > { %1342 = vmatprep.subr.bf16.mxu1 %v1644_v0 }
 0x199   : > { %1343 = vmatpush3.bf16.msra.mxu1 %v1474_v25 }
 0x19a   : > { %1344 = vmatprep.subr.bf16.mxu1 %v1644_v0 }
 0x19d   : > { %1345 = vmatpush3.bf16.msra.mxu1 %v1475_v26 }
 0x19e   : > { %1346 = vmatprep.subr.bf16.mxu1 %v1644_v0 }
 0x1a1   : > { %1347 = vmatpush3.bf16.msra.mxu1 %v1476_v27 }
 0x1a2   : > { %1348 = vmatprep.subr.bf16.mxu1 %v1644_v0 }
 0x1a5   : > { %1349 = vmatpush3.bf16.msra.mxu1 %v1477_v28 }
 0x1a6   : > { %1350 = vmatprep.subr.bf16.mxu1 %v1644_v0 }
 0x1a9   : > { %1351 = vmatpush3.bf16.msra.mxu1 %v1478_v29 }
 0x1ac   : > { %1353 = vmatmul.mubr.bf16.vlgmr.msra.gmra.mrb[8].mxu1 %v661_v22 }
 0x25f   : > { %v760_v30 = vpop.f32.mrb[4].mxu1  ;;  %v883_v31 = vpop.f32.mrb[8].mxu0 }
 0x260   : > { %v1314_v32 = vpop.f32.mrb[5].mxu1  ;;  %v1334_v33 = vpop.f32.mrb[9].mxu0  ;;  %v986_v36 = vrot.slane %v760_v30, 7  ;;  %v994_v37 = vrot.slane %v883_v31, 1 }
 0x261   : > { %v763_v34 = vpop.f32.mrb[6].mxu1  ;;  %v886_v35 = vpop.f32.mrb[10].mxu0 }
 0x262   : > { %v987_v38 = vrot.slane %v763_v34, 7  ;;  %v995_v39 = vrot.slane %v886_v35, 1  ;;  %v1315_v40 = vpop.f32.mrb[7].mxu1  ;;  %v1335_v41 = vpop.f32.mrb[11].mxu0 }
 0x264   : > { %v996_v42 = vsel %vm648_vm2, %v994_v37, %v995_v39  ;;  %v997_v0 = vsel %vm648_vm2, %v995_v39, %v994_v37  ;;  %v989_v43 = vsel %vm635_vm1, %v987_v38, %v986_v36  ;;  %v988_v44 = vsel %vm635_vm1, %v986_v36, %v987_v38 }
 0x265   : > { %v990_v50 = vsel %vm1943_vm3, 0.0, %v989_v43  ;;  %v999_v56 = vsel %vm1949_vm4, 0.0, %v997_v0 }
 0x27f   : > { %v979_v47 = vpop.f32.mrb[8].mxu1 }
 0x280   : > { %v980_v48 = vadd.f32 %v1166_v46, %v979_v47  ;;  %v1354_v49 = vpop.f32.mrb[9].mxu1 }
 0x281   : > { %v982_v51 = vpop.f32.mrb[10].mxu1 }
 0x282   : > { %v992_v52 = vadd.f32 %v990_v50, %v980_v48  ;;  %v983_v53 = vadd.f32 %v1166_v46, %v982_v51  ;;  %v1355_v54 = vpop.f32.mrb[11].mxu1 }
 0x284   : > { %v1000_v55 = vadd.f32 %v996_v42, %v992_v52  ;;  %v993_v45 = vadd.f32 %v988_v44, %v983_v53 }
 0x286   : > { %v1002_v57 = vadd.f32 %v1000_v55, %v1884_v14  ;;  %v1001_v58 = vadd.f32 %v999_v56, %v993_v45 }
 0x288   : > { %1004 = vst [vmem:[%s271_s11] sm:$0xff] %v1002_v57  ;;  %v1003_v59 = vadd.f32 %v1001_v58, %v1887_v15 }
 0x28a   : > { %1005 = vst [vmem:[%s271_s11 + $0x8] sm:$0xff] %v1003_v59 }
 0x28b   : > { %1578 = shalt.err (!%p1575_p2)
}
 0x28c   : > { %s1579_s6 = scalar_lea.hbm %s1986_s9, 256  ;;  %s1583_s8 = scalar_lea.hbm %s2038_s5, 512 }
 0x28d   : > { %p1580_p13 = scmp.ne.s32.totalorder %s1986_s9, %s1579_s6  ;;  %p1584_p4 = scmp.lt.u32.totalorder %s1986_s9, %s2038_s5 }
 0x28e   : > { %p1585_p5 = scmp.lt.u32.totalorder %s1583_s8, %s1579_s6  ;;  %p1587_p11 = scmp.lt.u32.totalorder %s1579_s6, %s1986_s9 }
 0x28f   : > { %p1581_p6 = pnand %p1580_p13, %p2056_p0 }
 0x290   : > { %p1586_p8 = por %p1585_p5, %p1584_p4 }
 0x291   : > { %p1582_p10 = pneg %p1581_p6 }
 0x292   : > { %p1588_p1 = por %p1587_p11, %p1586_p8 }
 0x294   : > { %p1589_p3 = pnand %p1588_p1, %p1582_p10 }
 0x296   : > { %1592 = shalt.err (!%p1589_p3)
}
 0x297   : > { %s1647_s30 = smov 128   ;;  %s1648_s15 = smov 8  }
 0x298   : > { %1366 = dma.vmem_to_hbm [thread:$0]  (%p2056_p0), %s1988_s28, 256, %s1986_s9, %s1007_s22, %s1647_s30, %s1647_s30, %s1648_s15  }
 0x299 PF: > { %s1035_s16 = sand.u32 1, %s1623_s18   ;;  %p2057_p7 = scmp.ne.s32.totalorder %s2043_s25, 0 }
 0x29a   : > { %p2058_p9 = scmp.ge.s32.totalorder %s1635_s21, 2  ;;  %s1036_s12 = scalar_lea.sflag [#allocation4], %s1035_s16 }
 0x29c   : > { %p1380_p12 = pnand %p2058_p9, %p2057_p7 }
 0x29e   : > { %1618 = dma.done.wait (!%p1380_p12), %s1036_s12, 256  }
 0x29f   : > { %1620 = vsyncadd (!%p1380_p12), %s1036_s12, 4294967040  ;;  %p19_p2 = scmp.ge.s32.totalorder %s1789_s14, 4   ;;  %s2059_s18 = smov %s1627_s19 }
 0x2a0   : > { %s2060_s19 = smov %s1631_s20  ;;  %s2061_s20 = smov %s1805_s27 }
 0x2a1   : > { %s2062_s21 = smov %s1789_s14  ;;  %21 = sbr.rel (!%p19_p2) target bundleno = 6 (0x6), region = 97 }
 0x2a8   :  { %1041 = vsyncpa [#allocation3], 1 }
 0x2a9   :  { %1043 = vsyncpa [#allocation3 + $0x1], 1 }
 0x2aa   :  { %1044 = vsyncpa [#allocation6], 1 }
 0x2ab   :  { %1045 = vsyncpa [#allocation4], 1 }
 0x2ac   :  { %1047 = vsyncpa [#allocation4 + $0x1], 1 }

</bundles_post_ra>
